<compile_context>
chip_gen: v7x
topology: tpu7x:2x2x1
jax: 0.10.0
libtpu: 0.0.40
codegen_flags: <defaults>
</compile_context>

<pallas_src>
import functools
import math

import jax
import jax.numpy as jnp
from jax import lax
from jax.experimental import pallas as pl
from jax.experimental.pallas import tpu as pltpu


def _mha_kernel(q_ref, k_ref, v_ref, kbias_ref,
                wq_ref, bq_ref, wk_ref, bk_ref, wv_ref, bv_ref,
                wo_ref, bo_ref,
                out_ref, ctxT_scr,
                *, bt, s, d_k):
    """Grid = (batch blocks, heads); the head axis is the inner 'arbitrary' axis.

    Per step: project the whole (bt*s, D) row block onto ONE head (K=D matmuls),
    run that head's softmax in f32, and deposit the head's context -- transposed,
    (d_k, s) -- into a (bt, D, s) VMEM scratch at sublane offset head*d_k.  On
    the last head the scratch holds the full concatenated context (transposed),
    and a single K=D output projection per batch element writes the output block.
    """
    head = pl.program_id(1)
    n_head = pl.num_programs(1)
    cdt = wq_ref.dtype                      # bf16 MXU operand dtype
    scale = 1.0 / math.sqrt(d_k)

    # f32 activations are DMA'd once per batch block (resident across the head
    # axis) and cast to bf16 on-chip; the recomputed cast per head step is
    # negligible VPU work next to the matmuls.
    x_q = q_ref[...].astype(cdt)            # (bt*s, D)
    x_k = k_ref[...].astype(cdt)
    x_v = v_ref[...].astype(cdt)

    # Per-head projections: full-depth K = D contractions, f32 accumulate + bias.
    qh = jnp.dot(x_q, wq_ref[0], preferred_element_type=jnp.float32) + bq_ref[0]  # (bt*s, d_k)
    kh = jnp.dot(x_k, wk_ref[0], preferred_element_type=jnp.float32) + bk_ref[0]
    vh = jnp.dot(x_v, wv_ref[0], preferred_element_type=jnp.float32) + bv_ref[0]

    off = pl.multiple_of(head * d_k, d_k)

    # Attention is inherently per batch element.  bt is a small static constant
    # (<= 8) and every iteration sinks straight into the VMEM scratch -- no
    # carried accumulator -- so live ranges stay bounded despite the static loop.
    for b in range(bt):
        rows = slice(b * s, (b + 1) * s)
        qb = qh[rows].astype(cdt)           # (s, d_k)
        kb = kh[rows].astype(cdt)
        vb = vh[rows].astype(cdt)
        # Transposed scores: scT[key, query] = sum_d K[key, d] * Q[query, d].
        scT = lax.dot_general(kb, qb, (((1,), (1,)), ((), ())),
                              preferred_element_type=jnp.float32)      # (s, s)
        scT = scT * scale + kbias_ref[b]    # (s, 1) key-padding bias, bcast over queries
        # Softmax over the key axis (= axis 0 here), all f32.
        mx = jnp.max(scT, axis=0, keepdims=True)
        e = jnp.exp(scT - mx)
        pT = e * pl.reciprocal(jnp.sum(e, axis=0, keepdims=True), approx=True)
        # Transposed context: ctxT[d, q] = sum_k V[k, d] * pT[k, q]   (A^T @ B form).
        ctxT = lax.dot_general(vb, pT.astype(cdt), (((0,), (0,)), ((), ())),
                               preferred_element_type=jnp.float32)     # (d_k, s)
        ctxT_scr[b, pl.ds(off, d_k), :] = ctxT

    # Last head: one full-depth (K = D) output projection per batch element.
    @pl.when(head == n_head - 1)
    def _():
        for b in range(bt):
            cb = ctxT_scr[b].astype(cdt)                                # (D, s)
            ob = lax.dot_general(cb, wo_ref[...], (((0,), (0,)), ((), ())),
                                 preferred_element_type=jnp.float32)    # (s, D)
            out_ref[b * s:(b + 1) * s, :] = (ob + bo_ref[...]).astype(out_ref.dtype)


def _num_tensorcores():
    """Best-effort TensorCore-per-device count (v4 / v5p / v7x megacore => 2)."""
    try:
        kind = jax.devices()[0].device_kind.lower()
    except Exception:
        return 1
    for tag in ("v4", "v5p", "v7", "tpu7"):
        if tag in kind:
            return 2
    return 1


def _choose_batch_block(B, S, *, max_rows=512, max_block=8):
    """Pick bt (batch elements per grid step).

    Targets ~max_rows MXU rows per step, keeps the in-kernel batch unroll small,
    respects the (8,128) row-tiling rule (prefers 16-row alignment for the bf16
    intermediates), and keeps >= 2 parallel grid steps on multi-TensorCore chips."""
    n_tc = _num_tensorcores()
    valid = []
    for cand in range(1, min(B, max_block) + 1):
        if B % cand:
            continue
        rows = cand * S
        if rows > max_rows and cand != 1:
            continue
        if rows % 8 and cand != B:
            continue
        if n_tc > 1 and B >= n_tc and (B // cand) < n_tc:
            continue
        valid.append(cand)
    if not valid:
        return 1 if (S % 8 == 0) else B
    aligned16 = [c for c in valid if (c * S) % 16 == 0]
    return max(aligned16) if aligned16 else max(valid)


def _vmem_limit_bytes(bt, S, D, d_k):
    """Explicit scoped-VMEM budget from the real footprint (2x safety margin)."""
    m = bt * S
    f32, bf16 = 4, 2
    est = 0
    est += 3 * 2 * m * D * f32                     # q/k/v f32 input blocks (double-buffered)
    est += 2 * bt * S * f32                        # key-padding bias blocks
    est += 3 * 2 * (D * d_k * bf16 + d_k * f32)    # per-head Wq/Wk/Wv + bias blocks
    est += 2 * (D * D * bf16 + D * f32)            # Wo + bo (worst case double-buffered)
    est += 2 * m * D * f32                         # output block
    est += bt * D * S * f32                        # transposed-context scratch
    est += 3 * m * D * bf16                        # bf16 activation copies
    est += 3 * m * d_k * (f32 + bf16)              # per-head projections
    est += 4 * S * S * f32                         # score / softmax temporaries
    return int(min(max(2 * est, 32 * 1024 * 1024), 128 * 1024 * 1024))


def mha_forward(q, k, v, key_keep, params, *, h, compute_dtype=jnp.bfloat16):
    """q,k,v: (B, S, D) float32; key_keep: (B, 1, 1, S) (0 => masked key);
    params: dict of transposed weights (D, D) and biases (1, D), float32."""
    B, S, D = q.shape
    assert D % h == 0
    d_k = D // h
    bt = _choose_batch_block(B, S)
    grid = (B // bt, h)
    m = bt * S

    # Flatten rows in the wrapper (free metadata reshape); activations stay f32
    # and are cast to bf16 inside the kernel.
    q2 = q.reshape(B * S, D)
    k2 = k.reshape(B * S, D)
    v2 = v.reshape(B * S, D)

    # Head-major weight layout so each head's projection block is a full-extent
    # (D, d_k) tile (keeps the (8,128) BlockSpec rule happy for any d_k).
    # One-time wrapper transposes, outside the kernel.
    def w_heads(w_t):   # (D, D) -> (h, D, d_k), bf16
        return w_t.reshape(D, h, d_k).transpose(1, 0, 2).astype(compute_dtype)

    def b_heads(b_):    # (1, D) -> (h, 1, d_k), f32
        return b_.reshape(1, h, d_k).transpose(1, 0, 2)

    wq, wk, wv = w_heads(params["wq_t"]), w_heads(params["wk_t"]), w_heads(params["wv_t"])
    bq, bk, bv = b_heads(params["bq"]), b_heads(params["bk"]), b_heads(params["bv"])
    wo = params["wo_t"].astype(compute_dtype)
    bo = params["bo"]

    # Additive key-padding bias laid out (B, S, 1): key positions on the sublane
    # axis to match the transposed-score layout used inside the kernel.
    kbias = jnp.where(key_keep.reshape(B, S, 1) == 0,
                      jnp.float32(-1e9), jnp.float32(0.0))

    kernel = functools.partial(_mha_kernel, bt=bt, s=S, d_k=d_k)

    x_spec = pl.BlockSpec((m, D), lambda b, i: (b, 0))            # resident across heads
    kb_spec = pl.BlockSpec((bt, S, 1), lambda b, i: (b, 0, 0))
    wp_spec = pl.BlockSpec((1, D, d_k), lambda b, i: (i, 0, 0))   # this head's columns
    bp_spec = pl.BlockSpec((1, 1, d_k), lambda b, i: (i, 0, 0))
    wo_spec = pl.BlockSpec((D, D), lambda b, i: (0, 0))           # resident
    bo_spec = pl.BlockSpec((1, D), lambda b, i: (0, 0))
    out_spec = pl.BlockSpec((m, D), lambda b, i: (b, 0))

    out2 = pl.pallas_call(
        kernel,
        out_shape=jax.ShapeDtypeStruct((B * S, D), jnp.float32),
        grid_spec=pltpu.PrefetchScalarGridSpec(
            num_scalar_prefetch=0,
            grid=grid,
            in_specs=[x_spec, x_spec, x_spec, kb_spec,
                      wp_spec, bp_spec, wp_spec, bp_spec, wp_spec, bp_spec,
                      wo_spec, bo_spec],
            out_specs=out_spec,
            scratch_shapes=[pltpu.VMEM((bt, D, S), jnp.float32)],
        ),
        compiler_params=pltpu.CompilerParams(
            dimension_semantics=("parallel", "arbitrary"),
            vmem_limit_bytes=_vmem_limit_bytes(bt, S, D, d_k)),
    )(q2, k2, v2, kbias, wq, bq, wk, bk, wv, bv, wo, bo)
    return out2.reshape(B, S, D)


def mha_reference(q, k, v, mask, params, *, h):
    """Pure-JAX f32 reference matching the PyTorch forward (masked_fill(-1e9) + softmax)."""
    B, S, D = q.shape
    d_k = D // h

    Q = q @ params["wq_t"] + params["bq"]
    K = k @ params["wk_t"] + params["bk"]
    V = v @ params["wv_t"] + params["bv"]

    def split(x):  # (B,S,D) -> (B,h,S,d_k)
        return x.reshape(B, S, h, d_k).transpose(0, 2, 1, 3)

    Qh, Kh, Vh = split(Q), split(K), split(V)
    scores = jnp.einsum("bhqd,bhkd->bhqk", Qh, Kh) / math.sqrt(d_k)
    scores = jnp.where(mask == 0, -1e9, scores)          # mask broadcasts (B,1,1,S)
    probs = jax.nn.softmax(scores, axis=-1)
    ctx = jnp.einsum("bhqk,bhkd->bhqd", probs, Vh)
    ctx = ctx.transpose(0, 2, 1, 3).reshape(B, S, D)
    return ctx @ params["wo_t"] + params["bo"]


def init_params(key, d_model):
    """Deterministic nn.Linear-style init; weights stored transposed (in, out), f32."""
    ks = jax.random.split(key, 8)
    bound = 1.0 / math.sqrt(d_model)

    def lin(kw, kb):
        w = jax.random.uniform(kw, (d_model, d_model), jnp.float32, -bound, bound)  # (out, in)
        b = jax.random.uniform(kb, (1, d_model), jnp.float32, -bound, bound)
        return w.T, b  # transpose -> (in, out)

    wq_t, bq = lin(ks[0], ks[1])
    wk_t, bk = lin(ks[2], ks[3])
    wv_t, bv = lin(ks[4], ks[5])
    wo_t, bo = lin(ks[6], ks[7])
    return dict(wq_t=wq_t, bq=bq, wk_t=wk_t, bk=bk,
                wv_t=wv_t, bv=bv, wo_t=wo_t, bo=bo)


if __name__ == "__main__":
    B, S, D, H = 2, 8, 32, 4  # batch, seq, d_model, heads (d_k = 8)

    root = jax.random.PRNGKey(0)
    kq, kk, kv, km, kp = jax.random.split(root, 5)

    q = jax.random.normal(kq, (B, S, D), jnp.float32)
    k = jax.random.normal(kk, (B, S, D), jnp.float32)
    v = jax.random.normal(kv, (B, S, D), jnp.float32)

    # Key-padding mask: (B, 1, 1, S); 1 = keep, 0 = masked.
    keep = (jax.random.uniform(km, (B, 1, 1, S)) > 0.2).astype(jnp.int32)
    keep = keep.at[..., 0].set(1)   # a padding mask always keeps >= 1 real token

    params = init_params(kp, D)

    out = mha_forward(q, k, v, keep, params, h=H)
    out = jax.block_until_ready(out)

    ref = mha_reference(q, k, v, keep, params, h=H)
    assert out.shape == (B, S, D)
    err = float(jnp.max(jnp.abs(out - ref)))
    # bf16 MXU operands + approx reciprocal vs f32 reference -> loosened tolerance
    # (softmax and all accumulation are still f32 inside the kernel).
    assert jnp.allclose(out, ref, atol=5e-2, rtol=5e-2), f"max abs err {err}"

    print("KERNEL_OK")
</pallas_src>

<mosaic_0001>
module attributes {stable_mosaic.version = 11 : i64} {
  func.func @_mha_kernel(%arg0: i32, %arg1: i32, %arg2: memref<16x32xf32, #tpu.memory_space<vmem>>, %arg3: memref<16x32xf32, #tpu.memory_space<vmem>>, %arg4: memref<16x32xf32, #tpu.memory_space<vmem>>, %arg5: memref<2x8x1xf32, #tpu.memory_space<vmem>>, %arg6: memref<1x32x8xbf16, #tpu.memory_space<vmem>>, %arg7: memref<1x1x8xf32, #tpu.memory_space<vmem>>, %arg8: memref<1x32x8xbf16, #tpu.memory_space<vmem>>, %arg9: memref<1x1x8xf32, #tpu.memory_space<vmem>>, %arg10: memref<1x32x8xbf16, #tpu.memory_space<vmem>>, %arg11: memref<1x1x8xf32, #tpu.memory_space<vmem>>, %arg12: memref<32x32xbf16, #tpu.memory_space<vmem>>, %arg13: memref<1x32xf32, #tpu.memory_space<vmem>>, %arg14: memref<16x32xf32, #tpu.memory_space<vmem>>, %arg15: memref<2x32x8xf32, #tpu.memory_space<vmem>>) attributes {dimension_semantics = [#tpu.dimension_semantics<parallel>, #tpu.dimension_semantics<arbitrary>], iteration_bounds = array<i64: 1, 4>, scalar_prefetch = 0 : i64, scratch_operands = 1 : i64, tpu.core_type = #tpu.core_type<tc>, window_params = [{transform_indices = @transform_0, window_bounds = array<i64: 16, 32>}, {transform_indices = @transform_1, window_bounds = array<i64: 16, 32>}, {transform_indices = @transform_2, window_bounds = array<i64: 16, 32>}, {transform_indices = @transform_3, window_bounds = array<i64: 2, 8, 1>}, {transform_indices = @transform_4, window_bounds = array<i64: 1, 32, 8>}, {transform_indices = @transform_5, window_bounds = array<i64: 1, 1, 8>}, {transform_indices = @transform_6, window_bounds = array<i64: 1, 32, 8>}, {transform_indices = @transform_7, window_bounds = array<i64: 1, 1, 8>}, {transform_indices = @transform_8, window_bounds = array<i64: 1, 32, 8>}, {transform_indices = @transform_9, window_bounds = array<i64: 1, 1, 8>}, {pipeline_mode = #tpu.pipeline_mode<synchronous>, transform_indices = @transform_10, window_bounds = array<i64: 32, 32>}, {pipeline_mode = #tpu.pipeline_mode<synchronous>, transform_indices = @transform_11, window_bounds = array<i64: 1, 32>}, {transform_indices = @transform_12, window_bounds = array<i64: 16, 32>}]} {
    %c0 = arith.constant 0 : index
    %c0_0 = arith.constant 0 : index
    %0 = vector.load %arg2[%c0, %c0_0] : memref<16x32xf32, #tpu.memory_space<vmem>>, vector<16x32xf32>
    %1 = arith.truncf %0 : vector<16x32xf32> to vector<16x32xbf16>
    %c0_1 = arith.constant 0 : index
    %c0_2 = arith.constant 0 : index
    %2 = vector.load %arg3[%c0_1, %c0_2] : memref<16x32xf32, #tpu.memory_space<vmem>>, vector<16x32xf32>
    %3 = arith.truncf %2 : vector<16x32xf32> to vector<16x32xbf16>
    %c0_3 = arith.constant 0 : index
    %c0_4 = arith.constant 0 : index
    %4 = vector.load %arg4[%c0_3, %c0_4] : memref<16x32xf32, #tpu.memory_space<vmem>>, vector<16x32xf32>
    %5 = arith.truncf %4 : vector<16x32xf32> to vector<16x32xbf16>
    %c0_5 = arith.constant 0 : index
    %c0_6 = arith.constant 0 : index
    %c0_7 = arith.constant 0 : index
    %6 = vector.load %arg6[%c0_5, %c0_6, %c0_7] : memref<1x32x8xbf16, #tpu.memory_space<vmem>>, vector<1x32x8xbf16>
    %7 = vector.shape_cast %6 : vector<1x32x8xbf16> to vector<32x8xbf16>
    %cst = arith.constant dense<0.000000e+00> : vector<16x8xf32>
    %8 = tpu.matmul %1, %7, %cst {dimension_numbers = #tpu.dot_dimension_numbers<[1], [0], [0], [1], [0, 0, 1, 1], [], []>} : vector<16x32xbf16>, vector<32x8xbf16>, vector<16x8xf32> -> vector<16x8xf32>
    %c0_8 = arith.constant 0 : index
    %c0_9 = arith.constant 0 : index
    %c0_10 = arith.constant 0 : index
    %9 = vector.load %arg7[%c0_8, %c0_9, %c0_10] : memref<1x1x8xf32, #tpu.memory_space<vmem>>, vector<1x1x8xf32>
    %10 = vector.shape_cast %9 : vector<1x1x8xf32> to vector<1x8xf32>
    %11 = vector.broadcast %10 : vector<1x8xf32> to vector<16x8xf32>
    %12 = arith.addf %8, %11 : vector<16x8xf32>
    %c0_11 = arith.constant 0 : index
    %c0_12 = arith.constant 0 : index
    %c0_13 = arith.constant 0 : index
    %13 = vector.load %arg8[%c0_11, %c0_12, %c0_13] : memref<1x32x8xbf16, #tpu.memory_space<vmem>>, vector<1x32x8xbf16>
    %14 = vector.shape_cast %13 : vector<1x32x8xbf16> to vector<32x8xbf16>
    %cst_14 = arith.constant dense<0.000000e+00> : vector<16x8xf32>
    %15 = tpu.matmul %3, %14, %cst_14 {dimension_numbers = #tpu.dot_dimension_numbers<[1], [0], [0], [1], [0, 0, 1, 1], [], []>} : vector<16x32xbf16>, vector<32x8xbf16>, vector<16x8xf32> -> vector<16x8xf32>
    %c0_15 = arith.constant 0 : index
    %c0_16 = arith.constant 0 : index
    %c0_17 = arith.constant 0 : index
    %16 = vector.load %arg9[%c0_15, %c0_16, %c0_17] : memref<1x1x8xf32, #tpu.memory_space<vmem>>, vector<1x1x8xf32>
    %17 = vector.shape_cast %16 : vector<1x1x8xf32> to vector<1x8xf32>
    %18 = vector.broadcast %17 : vector<1x8xf32> to vector<16x8xf32>
    %19 = arith.addf %15, %18 : vector<16x8xf32>
    %c0_18 = arith.constant 0 : index
    %c0_19 = arith.constant 0 : index
    %c0_20 = arith.constant 0 : index
    %20 = vector.load %arg10[%c0_18, %c0_19, %c0_20] : memref<1x32x8xbf16, #tpu.memory_space<vmem>>, vector<1x32x8xbf16>
    %21 = vector.shape_cast %20 : vector<1x32x8xbf16> to vector<32x8xbf16>
    %cst_21 = arith.constant dense<0.000000e+00> : vector<16x8xf32>
    %22 = tpu.matmul %5, %21, %cst_21 {dimension_numbers = #tpu.dot_dimension_numbers<[1], [0], [0], [1], [0, 0, 1, 1], [], []>} : vector<16x32xbf16>, vector<32x8xbf16>, vector<16x8xf32> -> vector<16x8xf32>
    %c0_22 = arith.constant 0 : index
    %c0_23 = arith.constant 0 : index
    %c0_24 = arith.constant 0 : index
    %23 = vector.load %arg11[%c0_22, %c0_23, %c0_24] : memref<1x1x8xf32, #tpu.memory_space<vmem>>, vector<1x1x8xf32>
    %24 = vector.shape_cast %23 : vector<1x1x8xf32> to vector<1x8xf32>
    %25 = vector.broadcast %24 : vector<1x8xf32> to vector<16x8xf32>
    %26 = arith.addf %22, %25 : vector<16x8xf32>
    %c8_i32 = arith.constant 8 : i32
    %27 = arith.muli %arg1, %c8_i32 : i32
    %28 = tpu.assume_multiple %27, 8 : i32
    %29 = vector.extract_strided_slice %12 {offsets = [0, 0], sizes = [8, 8], strides = [1, 1]} : vector<16x8xf32> to vector<8x8xf32>
    %30 = arith.truncf %29 : vector<8x8xf32> to vector<8x8xbf16>
    %31 = vector.extract_strided_slice %19 {offsets = [0, 0], sizes = [8, 8], strides = [1, 1]} : vector<16x8xf32> to vector<8x8xf32>
    %32 = arith.truncf %31 : vector<8x8xf32> to vector<8x8xbf16>
    %33 = vector.extract_strided_slice %26 {offsets = [0, 0], sizes = [8, 8], strides = [1, 1]} : vector<16x8xf32> to vector<8x8xf32>
    %34 = arith.truncf %33 : vector<8x8xf32> to vector<8x8xbf16>
    %cst_25 = arith.constant dense<0.000000e+00> : vector<8x8xf32>
    %35 = tpu.matmul %32, %30, %cst_25 {dimension_numbers = #tpu.dot_dimension_numbers<[1], [1], [0], [0], [0, 0, 1, 0], [], []>} : vector<8x8xbf16>, vector<8x8xbf16>, vector<8x8xf32> -> vector<8x8xf32>
    %cst_26 = arith.constant 0.353553385 : f32
    %36 = vector.broadcast %cst_26 : f32 to vector<8x8xf32>
    %37 = arith.mulf %35, %36 : vector<8x8xf32>
    %c0_27 = arith.constant 0 : index
    %c0_28 = arith.constant 0 : index
    %c0_29 = arith.constant 0 : index
    %38 = vector.load %arg5[%c0_27, %c0_28, %c0_29] : memref<2x8x1xf32, #tpu.memory_space<vmem>>, vector<1x8x1xf32>
    %39 = vector.shape_cast %38 : vector<1x8x1xf32> to vector<8x1xf32>
    %40 = vector.broadcast %39 : vector<8x1xf32> to vector<8x8xf32>
    %41 = arith.addf %37, %40 : vector<8x8xf32>
    %cst_30 = arith.constant dense<0xFF800000> : vector<8xf32>
    %42 = vector.multi_reduction <maximumf>, %41, %cst_30 [0] : vector<8x8xf32> to vector<8xf32>
    %43 = vector.shape_cast %42 : vector<8xf32> to vector<1x8xf32>
    %44 = vector.broadcast %43 : vector<1x8xf32> to vector<8x8xf32>
    %45 = arith.subf %41, %44 : vector<8x8xf32>
    %46 = math.exp %45 : vector<8x8xf32>
    %cst_31 = arith.constant dense<0.000000e+00> : vector<8xf32>
    %47 = vector.multi_reduction <add>, %46, %cst_31 [0] : vector<8x8xf32> to vector<8xf32>
    %48 = vector.shape_cast %47 : vector<8xf32> to vector<1x8xf32>
    %49 = tpu.reciprocal %48 {approx = true} : vector<1x8xf32> -> vector<1x8xf32>
    %50 = vector.broadcast %49 : vector<1x8xf32> to vector<8x8xf32>
    %51 = arith.mulf %46, %50 : vector<8x8xf32>
    %52 = arith.truncf %51 : vector<8x8xf32> to vector<8x8xbf16>
    %cst_32 = arith.constant dense<0.000000e+00> : vector<8x8xf32>
    %53 = tpu.matmul %34, %52, %cst_32 {dimension_numbers = #tpu.dot_dimension_numbers<[0], [0], [1], [1], [0, 1, 1, 1], [], []>} : vector<8x8xbf16>, vector<8x8xbf16>, vector<8x8xf32> -> vector<8x8xf32>
    %c0_33 = arith.constant 0 : index
    %54 = arith.index_cast %28 : i32 to index
    %c0_34 = arith.constant 0 : index
    %55 = vector.load %arg15[%c0_33, %54, %c0_34] : memref<2x32x8xf32, #tpu.memory_space<vmem>>, vector<1x8x8xf32>
    %56 = vector.shape_cast %55 : vector<1x8x8xf32> to vector<8x8xf32>
    %57 = vector.shape_cast %53 : vector<8x8xf32> to vector<1x8x8xf32>
    tpu.vector_store %arg15[%c0_33, %54, %c0_34], %57 {strides = array<i32>} : memref<2x32x8xf32, #tpu.memory_space<vmem>>, vector<1x8x8xf32>,
    %58 = vector.extract_strided_slice %12 {offsets = [8, 0], sizes = [8, 8], strides = [1, 1]} : vector<16x8xf32> to vector<8x8xf32>
    %59 = arith.truncf %58 : vector<8x8xf32> to vector<8x8xbf16>
    %60 = vector.extract_strided_slice %19 {offsets = [8, 0], sizes = [8, 8], strides = [1, 1]} : vector<16x8xf32> to vector<8x8xf32>
    %61 = arith.truncf %60 : vector<8x8xf32> to vector<8x8xbf16>
    %62 = vector.extract_strided_slice %26 {offsets = [8, 0], sizes = [8, 8], strides = [1, 1]} : vector<16x8xf32> to vector<8x8xf32>
    %63 = arith.truncf %62 : vector<8x8xf32> to vector<8x8xbf16>
    %cst_35 = arith.constant dense<0.000000e+00> : vector<8x8xf32>
    %64 = tpu.matmul %61, %59, %cst_35 {dimension_numbers = #tpu.dot_dimension_numbers<[1], [1], [0], [0], [0, 0, 1, 0], [], []>} : vector<8x8xbf16>, vector<8x8xbf16>, vector<8x8xf32> -> vector<8x8xf32>
    %cst_36 = arith.constant 0.353553385 : f32
    %65 = vector.broadcast %cst_36 : f32 to vector<8x8xf32>
    %66 = arith.mulf %64, %65 : vector<8x8xf32>
    %c1 = arith.constant 1 : index
    %c0_37 = arith.constant 0 : index
    %c0_38 = arith.constant 0 : index
    %67 = vector.load %arg5[%c1, %c0_37, %c0_38] : memref<2x8x1xf32, #tpu.memory_space<vmem>>, vector<1x8x1xf32>
    %68 = vector.shape_cast %67 : vector<1x8x1xf32> to vector<8x1xf32>
    %69 = vector.broadcast %68 : vector<8x1xf32> to vector<8x8xf32>
    %70 = arith.addf %66, %69 : vector<8x8xf32>
    %cst_39 = arith.constant dense<0xFF800000> : vector<8xf32>
    %71 = vector.multi_reduction <maximumf>, %70, %cst_39 [0] : vector<8x8xf32> to vector<8xf32>
    %72 = vector.shape_cast %71 : vector<8xf32> to vector<1x8xf32>
    %73 = vector.broadcast %72 : vector<1x8xf32> to vector<8x8xf32>
    %74 = arith.subf %70, %73 : vector<8x8xf32>
    %75 = math.exp %74 : vector<8x8xf32>
    %cst_40 = arith.constant dense<0.000000e+00> : vector<8xf32>
    %76 = vector.multi_reduction <add>, %75, %cst_40 [0] : vector<8x8xf32> to vector<8xf32>
    %77 = vector.shape_cast %76 : vector<8xf32> to vector<1x8xf32>
    %78 = tpu.reciprocal %77 {approx = true} : vector<1x8xf32> -> vector<1x8xf32>
    %79 = vector.broadcast %78 : vector<1x8xf32> to vector<8x8xf32>
    %80 = arith.mulf %75, %79 : vector<8x8xf32>
    %81 = arith.truncf %80 : vector<8x8xf32> to vector<8x8xbf16>
    %cst_41 = arith.constant dense<0.000000e+00> : vector<8x8xf32>
    %82 = tpu.matmul %63, %81, %cst_41 {dimension_numbers = #tpu.dot_dimension_numbers<[0], [0], [1], [1], [0, 1, 1, 1], [], []>} : vector<8x8xbf16>, vector<8x8xbf16>, vector<8x8xf32> -> vector<8x8xf32>
    %c1_42 = arith.constant 1 : index
    %83 = arith.index_cast %28 : i32 to index
    %c0_43 = arith.constant 0 : index
    %84 = vector.load %arg15[%c1_42, %83, %c0_43] : memref<2x32x8xf32, #tpu.memory_space<vmem>>, vector<1x8x8xf32>
    %85 = vector.shape_cast %84 : vector<1x8x8xf32> to vector<8x8xf32>
    %86 = vector.shape_cast %82 : vector<8x8xf32> to vector<1x8x8xf32>
    tpu.vector_store %arg15[%c1_42, %83, %c0_43], %86 {strides = array<i32>} : memref<2x32x8xf32, #tpu.memory_space<vmem>>, vector<1x8x8xf32>,
    %c3_i32 = arith.constant 3 : i32
    %87 = arith.cmpi eq, %arg1, %c3_i32 : i32
    %88 = arith.extui %87 : i1 to i32
    %c0_i32 = arith.constant 0 : i32
    %89 = arith.cmpi ne, %88, %c0_i32 : i32
    scf.if %89 {
      %c0_44 = arith.constant 0 : index
      %c0_45 = arith.constant 0 : index
      %c0_46 = arith.constant 0 : index
      %90 = vector.load %arg15[%c0_44, %c0_45, %c0_46] : memref<2x32x8xf32, #tpu.memory_space<vmem>>, vector<1x32x8xf32>
      %91 = vector.shape_cast %90 : vector<1x32x8xf32> to vector<32x8xf32>
      %92 = arith.truncf %91 : vector<32x8xf32> to vector<32x8xbf16>
      %c0_47 = arith.constant 0 : index
      %c0_48 = arith.constant 0 : index
      %93 = vector.load %arg12[%c0_47, %c0_48] : memref<32x32xbf16, #tpu.memory_space<vmem>>, vector<32x32xbf16>
      %cst_49 = arith.constant dense<0.000000e+00> : vector<8x32xf32>
      %94 = tpu.matmul %92, %93, %cst_49 {dimension_numbers = #tpu.dot_dimension_numbers<[0], [0], [1], [1], [0, 1, 1, 1], [], []>} : vector<32x8xbf16>, vector<32x32xbf16>, vector<8x32xf32> -> vector<8x32xf32>
      %c0_50 = arith.constant 0 : index
      %c0_51 = arith.constant 0 : index
      %95 = vector.load %arg13[%c0_50, %c0_51] : memref<1x32xf32, #tpu.memory_space<vmem>>, vector<1x32xf32>
      %96 = vector.broadcast %95 : vector<1x32xf32> to vector<8x32xf32>
      %97 = arith.addf %94, %96 : vector<8x32xf32>
      %c0_52 = arith.constant 0 : index
      %c0_53 = arith.constant 0 : index
      %98 = vector.load %arg14[%c0_52, %c0_53] : memref<16x32xf32, #tpu.memory_space<vmem>>, vector<8x32xf32>
      tpu.vector_store %arg14[%c0_52, %c0_53], %97 {strides = array<i32>} : memref<16x32xf32, #tpu.memory_space<vmem>>, vector<8x32xf32>,
      %c1_54 = arith.constant 1 : index
      %c0_55 = arith.constant 0 : index
      %c0_56 = arith.constant 0 : index
      %99 = vector.load %arg15[%c1_54, %c0_55, %c0_56] : memref<2x32x8xf32, #tpu.memory_space<vmem>>, vector<1x32x8xf32>
      %100 = vector.shape_cast %99 : vector<1x32x8xf32> to vector<32x8xf32>
      %101 = arith.truncf %100 : vector<32x8xf32> to vector<32x8xbf16>
      %c0_57 = arith.constant 0 : index
      %c0_58 = arith.constant 0 : index
      %102 = vector.load %arg12[%c0_57, %c0_58] : memref<32x32xbf16, #tpu.memory_space<vmem>>, vector<32x32xbf16>
      %cst_59 = arith.constant dense<0.000000e+00> : vector<8x32xf32>
      %103 = tpu.matmul %101, %102, %cst_59 {dimension_numbers = #tpu.dot_dimension_numbers<[0], [0], [1], [1], [0, 1, 1, 1], [], []>} : vector<32x8xbf16>, vector<32x32xbf16>, vector<8x32xf32> -> vector<8x32xf32>
      %c0_60 = arith.constant 0 : index
      %c0_61 = arith.constant 0 : index
      %104 = vector.load %arg13[%c0_60, %c0_61] : memref<1x32xf32, #tpu.memory_space<vmem>>, vector<1x32xf32>
      %105 = vector.broadcast %104 : vector<1x32xf32> to vector<8x32xf32>
      %106 = arith.addf %103, %105 : vector<8x32xf32>
      %c8 = arith.constant 8 : index
      %c0_62 = arith.constant 0 : index
      %107 = vector.load %arg14[%c8, %c0_62] : memref<16x32xf32, #tpu.memory_space<vmem>>, vector<8x32xf32>
      tpu.vector_store %arg14[%c8, %c0_62], %106 {strides = array<i32>} : memref<16x32xf32, #tpu.memory_space<vmem>>, vector<8x32xf32>,
    } else {
    }
    return
  }
  func.func @transform_0(%arg0: i32, %arg1: i32) -> (i32, i32) {
    %c0_i32 = arith.constant 0 : i32
    %c0_i32_0 = arith.constant 0 : i32
    return %arg0, %c0_i32 : i32, i32
  }
  func.func @transform_1(%arg0: i32, %arg1: i32) -> (i32, i32) {
    %c0_i32 = arith.constant 0 : i32
    %c0_i32_0 = arith.constant 0 : i32
    return %arg0, %c0_i32 : i32, i32
  }
  func.func @transform_2(%arg0: i32, %arg1: i32) -> (i32, i32) {
    %c0_i32 = arith.constant 0 : i32
    %c0_i32_0 = arith.constant 0 : i32
    return %arg0, %c0_i32 : i32, i32
  }
  func.func @transform_3(%arg0: i32, %arg1: i32) -> (i32, i32, i32) {
    %c0_i32 = arith.constant 0 : i32
    %c0_i32_0 = arith.constant 0 : i32
    %c0_i32_1 = arith.constant 0 : i32
    return %arg0, %c0_i32, %c0_i32_0 : i32, i32, i32
  }
  func.func @transform_4(%arg0: i32, %arg1: i32) -> (i32, i32, i32) {
    %c0_i32 = arith.constant 0 : i32
    %c0_i32_0 = arith.constant 0 : i32
    %c0_i32_1 = arith.constant 0 : i32
    return %arg1, %c0_i32, %c0_i32_0 : i32, i32, i32
  }
  func.func @transform_5(%arg0: i32, %arg1: i32) -> (i32, i32, i32) {
    %c0_i32 = arith.constant 0 : i32
    %c0_i32_0 = arith.constant 0 : i32
    %c0_i32_1 = arith.constant 0 : i32
    return %arg1, %c0_i32, %c0_i32_0 : i32, i32, i32
  }
  func.func @transform_6(%arg0: i32, %arg1: i32) -> (i32, i32, i32) {
    %c0_i32 = arith.constant 0 : i32
    %c0_i32_0 = arith.constant 0 : i32
    %c0_i32_1 = arith.constant 0 : i32
    return %arg1, %c0_i32, %c0_i32_0 : i32, i32, i32
  }
  func.func @transform_7(%arg0: i32, %arg1: i32) -> (i32, i32, i32) {
    %c0_i32 = arith.constant 0 : i32
    %c0_i32_0 = arith.constant 0 : i32
    %c0_i32_1 = arith.constant 0 : i32
    return %arg1, %c0_i32, %c0_i32_0 : i32, i32, i32
  }
  func.func @transform_8(%arg0: i32, %arg1: i32) -> (i32, i32, i32) {
    %c0_i32 = arith.constant 0 : i32
    %c0_i32_0 = arith.constant 0 : i32
    %c0_i32_1 = arith.constant 0 : i32
    return %arg1, %c0_i32, %c0_i32_0 : i32, i32, i32
  }
  func.func @transform_9(%arg0: i32, %arg1: i32) -> (i32, i32, i32) {
    %c0_i32 = arith.constant 0 : i32
    %c0_i32_0 = arith.constant 0 : i32
    %c0_i32_1 = arith.constant 0 : i32
    return %arg1, %c0_i32, %c0_i32_0 : i32, i32, i32
  }
  func.func @transform_10(%arg0: i32, %arg1: i32) -> (i32, i32) {
    %c0_i32 = arith.constant 0 : i32
    %c0_i32_0 = arith.constant 0 : i32
    %c0_i32_1 = arith.constant 0 : i32
    return %c0_i32, %c0_i32_0 : i32, i32
  }
  func.func @transform_11(%arg0: i32, %arg1: i32) -> (i32, i32) {
    %c0_i32 = arith.constant 0 : i32
    %c0_i32_0 = arith.constant 0 : i32
    %c0_i32_1 = arith.constant 0 : i32
    return %c0_i32, %c0_i32_0 : i32, i32
  }
  func.func @transform_12(%arg0: i32, %arg1: i32) -> (i32, i32) {
    %c0_i32 = arith.constant 0 : i32
    %c0_i32_0 = arith.constant 0 : i32
    return %arg0, %c0_i32 : i32, i32
  }
}

</mosaic_0001>

<bundles_post_ra>
// kernel: tpu_custom_call.1
= control target key start
LH: loop header
LB: loop body
LE: loop exit
PB: predicated region body
PF: predicated region fallthrough
CT: control target
= control target key end

     0   :  { %17 = vsyncpa [#allocation4], 0  ;;  %s1770_s21 = smov 0   ;;  %s1772_s22 = smov 0   ;;  %s1938_s0 = inlined_call_operand.vmem [shape: f32[16,32], index: 0, kind: input, shape index: {}]   ;;  %s1939_s1 = inlined_call_operand.vmem [shape: f32[16,32], index: 1, kind: input, shape index: {}]   ;;  %s1940_s2 = inlined_call_operand.vmem [shape: f32[16,32], index: 2, kind: input, shape index: {}]   ;;  %s1941_s3 = inlined_call_operand.vmem [shape: f32[2,8,1], index: 3, kind: input, shape index: {}]   ;;  %s1942_s4 = inlined_call_operand.vmem [shape: bf16[4,32,8], index: 4, kind: input, shape index: {}]   ;;  %s1943_s5 = inlined_call_operand.vmem [shape: f32[4,1,8], index: 5, kind: input, shape index: {}]   ;;  %s1944_s6 = inlined_call_operand.vmem [shape: bf16[4,32,8], index: 6, kind: input, shape index: {}]   ;;  %s1945_s7 = inlined_call_operand.vmem [shape: f32[4,1,8], index: 7, kind: input, shape index: {}]   ;;  %s1946_s8 = inlined_call_operand.vmem [shape: bf16[4,32,8], index: 8, kind: input, shape index: {}]   ;;  %s1947_s9 = inlined_call_operand.vmem [shape: f32[4,1,8], index: 9, kind: input, shape index: {}]   ;;  %s1948_s10 = inlined_call_operand.vmem [shape: bf16[32,32], index: 10, kind: input, shape index: {}]   ;;  %s1949_s11 = inlined_call_operand.vmem [shape: f32[1,32], index: 11, kind: input, shape index: {}]   ;;  %s1950_s12 = inlined_call_operand.hbm [shape: f32[16,32], index: 12, kind: output, shape index: {}]  }
   0x1   :  { %s1774_s23 = smov 0  }
   0x2 LB: > { %s32_s25 = sadd.s32 1, %s1691_s22  ;;  %p1455_p1 = scmp.ge.s32.totalorder %s1695_s23, 1  ;;  %s1695_s23 = sphi %s1774_s23, %s23_s23   ;;  %s1691_s22 = sphi %s1772_s22, %s1954_s22   ;;  %s1687_s21 = sphi %s1770_s21, %s1953_s21  }
   0x3   : > { %p33_p0 = scmp.ge.s32.totalorder %s32_s25, 4  ;;  %p463_p2 = scmp.lt.s32.totalorder %s1695_s23, 5 }
   0x5   : > { %s1956_s25 = smov (%p33_p0, %s32_s25), 0  ;;  %p464_p3 = pnand %p1455_p1, %p463_p2 }
   0x6   : > { %p563_p4 = scmp.lt.s32.totalorder (!%p464_p3), %s1687_s21, 3  ;;  %v1697_v0 = vmov (!%p464_p3), 0.0   ;;  %vm1698_vm0 = vmmov (!%p464_p3), 0   ;;  %v589_v2 = vld [vmem:[%s1938_s0] sm:$0xff] (!%p464_p3)  ;;  %v590_v3 = vld [vmem:[%s1938_s0 + $0x8] sm:$0xff] (!%p464_p3)  ;;  %vm621_vm1 = vcmask (!%p464_p3), 261120  }
   0x7   : > { %467 = sbr.rel (%p464_p3) target bundleno = 1101 (0x44d), region = 68  ;;  %1521 = vmatprep.subr.bf16.mxu0 (!%p464_p3), %v1697_v0  ;;  %1529 = vmatprep.subr.bf16.mxu1 (!%p464_p3), %v1697_v0  ;;  %v592_v6 = vld [vmem:[%s1939_s1] sm:$0xff] (!%p464_p3)  ;;  %v593_v7 = vld [vmem:[%s1939_s1 + $0x8] sm:$0xff] (!%p464_p3)  ;;  %v591_v9 = vpack.c.bf16 (!%p464_p3), %v590_v3, %v589_v2  ;;  %v1699_v17 = vmov (!%p464_p3), 0   ;;  %vm804_vm2 = vcmask (!%p464_p3), 64512   ;;  %vm898_vm3 = vcmask (!%p464_p3), 1043456  }
   0x8   : > { %1525 = vmatprep.mubr.msk.bf16.mxu0 (!%p464_p3), %vm1698_vm0, %v1697_v0  ;;  %1533 = vmatprep.mubr.msk.bf16.mxu1 (!%p464_p3), %vm1698_vm0, %v1697_v0  ;;  %v594_v11 = vpack.c.bf16 (!%p464_p3), %v593_v7, %v592_v6  ;;  %v595_v13 = vld [vmem:[%s1940_s2] sm:$0xff] (!%p464_p3)  ;;  %v596_v14 = vld [vmem:[%s1940_s2 + $0x8] sm:$0xff] (!%p464_p3)  ;;  %p1482_p5 = scmp.ne.s32.totalorder (!%p464_p3), %s1687_s21, 3 }
   0x9   : > { %v597_v15 = vpack.c.bf16 (!%p464_p3), %v596_v14, %v595_v13  ;;  %v852_v16 = vld [vmem:[%s1941_s3] sm:$0xff] (!%p464_p3)  ;;  %1624 = vset.pattern.permute.xlu0 (!%p464_p3), %v1699_v17  ;;  %v1478_v18 = vld [vmem:[%s1941_s3 + $0x8] sm:$0xff] (!%p464_p3) }
   0xa   : > { %855 = vperm.xlu0 (!%p464_p3), %1624, %v852_v16  }
   0xe   : > { %s1795_s26 = scalar_select %p563_p4, %s1687_s21, 3  ;;  %998 = vperm.xlu0 %1624, %v1478_v18  }
   0xf   : > { %vm1701_vm4 = vmmov (!%p1482_p5), 0  }
  0x10   : > { %s1495_s27 = sshll.u32 %s1795_s26, 4  ;;  %s578_s24 = scalar_lea.vmem %s1945_s7, %s1795_s26 }
  0x11   : > { %s567_s30 = scalar_lea.vmem %s1942_s4, %s1495_s27  ;;  %s575_s15 = scalar_lea.vmem %s1944_s6, %s1495_s27  ;;  %v1466_v24 = vld [vmem:[%s578_s24] ss:$0 sm:$0xff] }
  0x12   : > { %v1625_v1 = vld [vmem:[%s567_s30] sm:$0xff]   ;;  %v1626_v4 = vld [vmem:[%s567_s30 + $0x8] sm:$0xff]   ;;  %s583_s13 = scalar_lea.vmem %s1946_s8, %s1495_s27 }
  0x13   : > { %1522 = vmatpush3.bf16.msra.mxu0 %v1625_v1  ;;  %v1627_v5 = vld [vmem:[%s575_s15] sm:$0xff]   ;;  %v1628_v8 = vld [vmem:[%s575_s15 + $0x8] sm:$0xff]   ;;  %s586_s15 = scalar_lea.vmem %s1947_s9, %s1795_s26 }
  0x14   : > { %1523 = vmatprep.subr.bf16.mxu0 %v1697_v0  ;;  %1530 = vmatpush3.bf16.msra.mxu1 %v1627_v5  ;;  %v1629_v10 = vld [vmem:[%s583_s13] sm:$0xff]   ;;  %v1630_v12 = vld [vmem:[%s583_s13 + $0x8] sm:$0xff]   ;;  %s570_s13 = scalar_lea.vmem %s1943_s5, %s1795_s26  ;;  %s1474_s26 = sshll.u32 %s1687_s21, 3 }
  0x15   : > { %1531 = vmatprep.subr.bf16.mxu1 %v1697_v0  ;;  %v1462_v19 = vld [vmem:[%s570_s13] ss:$0 sm:$0xff]  ;;  %s942_s17 = scalar_lea.vmem [#allocation2], %s1474_s26 }
  0x16   : > { %v1470_v34 = vld [vmem:[%s586_s15] ss:$0 sm:$0xff] }
  0x17   : > { %1524 = vmatpush3.bf16.msra.mxu0 %v1626_v4 }
  0x18   : > { %1537 = vmatprep.subr.bf16.mxu0 %v1697_v0  ;;  %1532 = vmatpush3.bf16.msra.mxu1 %v1628_v8 }
  0x19   : > { %1545 = vmatprep.subr.bf16.mxu1 %v1697_v0 }
  0x1a   : > { %1526 = vmatmul.mubr.msk.bf16.vlgmr.msra.gmra.mrb[0].mxu0 %vm621_vm1, %v591_v9 }
  0x1b   : > { %1538 = vmatpush3.bf16.msra.mxu0 %v1629_v10  ;;  %1541 = vmatprep.mubr.msk.bf16.mxu0 %vm1698_vm0, %v1697_v0 }
  0x1c   : > { %1534 = vmatmul.mubr.msk.bf16.vlgmr.msra.gmra.mrb[0].mxu1 %vm621_vm1, %v594_v11  ;;  %1539 = vmatprep.subr.bf16.mxu0 %v1697_v0 }
  0x1d   : > { %1547 = vmatprep.mubr.msk.bf16.mxu1 %vm1698_vm0, %v1697_v0 }
  0x1f   : > { %1540 = vmatpush3.bf16.msra.mxu0 %v1630_v12 }
  0x20   : > { %1551 = vmatprep.subr.bf16.mxu0 %v1697_v0 }
  0x22   : > { %1542 = vmatmul.mubr.msk.bf16.vlgmr.msra.gmra.mrb[4].mxu0 %vm621_vm1, %v597_v15 }
  0x23   : > { %1553 = vmatprep.mubr.msk.bf16.mxu0 %vm1698_vm0, %v1697_v0 }
  0x89   : > { %v856_v51 = vpop.permute.xlu0 %855 }
  0x8d   : > { %v999_v62 = vpop.permute.xlu0 %998 }
  0xed   : > { %v659_v20 = vpop.f32.mrb[0].mxu0 }
  0xee   : > { %v660_v21 = vadd.f32 %v1462_v19, %v659_v20  ;;  %v1527_v22 = vpop.f32.mrb[1].mxu0 }
  0xef   : > { %v662_v23 = vpop.f32.mrb[2].mxu0  ;;  %v726_v25 = vpop.f32.mrb[0].mxu1 }
  0xf0   : > { %v801_v26 = vpack.c.bf16 %v660_v21, %v660_v21  ;;  %v1528_v27 = vpop.f32.mrb[3].mxu0  ;;  %v1535_v28 = vpop.f32.mrb[1].mxu1  ;;  %v663_v31 = vadd.f32 %v1462_v19, %v662_v23  ;;  %v727_v32 = vadd.f32 %v1466_v24, %v726_v25 }
  0xf1   : > { %v729_v29 = vpop.f32.mrb[2].mxu1 }
  0xf2   : > { %v809_v30 = vsel %vm804_vm2, %v801_v26, 0  ;;  %v1536_v33 = vpop.f32.mrb[3].mxu1  ;;  %v944_v36 = vpack.c.bf16 %v663_v31, %v663_v31  ;;  %v802_v37 = vpack.c.bf16 %v727_v32, %v727_v32  ;;  %v730_v46 = vadd.f32 %v1466_v24, %v729_v29 }
  0xf3   : > { %1546 = vmatpush3.bf16.xpose.msra.mxu1 %v809_v30 }
  0xf4   : > { %1557 = vmatprep.subr.bf16.mxu1 %v1697_v0  ;;  %v951_v44 = vsel %vm804_vm2, %v944_v36, 0  ;;  %v945_v47 = vpack.c.bf16 %v730_v46, %v730_v46 }
  0xf5   : > { %v793_v35 = vpop.f32.mrb[4].mxu0 }
  0xf6   : > { %v1543_v38 = vpop.f32.mrb[5].mxu0  ;;  %v794_v39 = vadd.f32 %v1470_v34, %v793_v35 }
  0xf7   : > { %v796_v40 = vpop.f32.mrb[6].mxu0 }
  0xf8   : > { %v797_v41 = vadd.f32 %v1470_v34, %v796_v40  ;;  %v1544_v42 = vpop.f32.mrb[7].mxu0  ;;  %v803_v43 = vpack.c.bf16 %v794_v39, %v794_v39 }
  0xfa   : > { %1548 = vmatmul.mubr.msk.bf16.vlgmr.msra.gmra.mrb[4].mxu1 %vm804_vm2, %v802_v37  ;;  %v946_v45 = vpack.c.bf16 %v797_v41, %v797_v41  ;;  %879 = vxpose.xlu1.c.b16.start.end [1/1] (short) (narrow) %v803_v43, 16 }
  0xfb   : > { %1558 = vmatpush3.bf16.xpose.msra.mxu1 %v951_v44  ;;  %1559 = vmatprep.mubr.msk.bf16.mxu1 %vm1698_vm0, %v1697_v0 }
  0xfe   : > { %1022 = vxpose.xlu1.c.b16.start.end [1/1] (short) (narrow) %v946_v45, 16 }
 0x102   : > { %1560 = vmatmul.mubr.msk.bf16.vlgmr.msra.gmra.mrb[8].mxu1 %vm804_vm2, %v945_v47 }
 0x160   : > { %v887_v37 = vpop.trf.xlu1 }
 0x164   : > { %v1030_v42 = vpop.trf.xlu1 }
 0x1cd   : > { %v845_v48 = vpop.f32.mrb[4].mxu1 }
 0x1ce   : > { %v851_v49 = vmul.f32 0.35355338, %v845_v48  ;;  %v1549_v50 = vpop.f32.mrb[5].mxu1 }
 0x1cf   : > { %v848_v52 = vpop.f32.mrb[6].mxu1 }
 0x1d0   : > { %v858_v53 = vadd.f32 %v856_v51, %v851_v49  ;;  %v1550_v54 = vpop.f32.mrb[7].mxu1 }
 0x1d2   : > { %v859_v55 = vsel %vm804_vm2, %v858_v53, -inf }
 0x1d3   : > { %v860_v56 = vrot.slane %v859_v55, 4 }
 0x1d5   : > { %v861_v57 = vmax.f32 %v859_v55, %v860_v56  ;;  %v987_v58 = vpop.f32.mrb[8].mxu1 }
 0x1d6   : > { %v993_v59 = vmul.f32 0.35355338, %v987_v58  ;;  %v1561_v60 = vpop.f32.mrb[9].mxu1 }
 0x1d7   : > { %v862_v61 = vrot.slane %v861_v57, 2  ;;  %v990_v63 = vpop.f32.mrb[10].mxu1 }
 0x1d8   : > { %v1001_v1 = vadd.f32 %v999_v62, %v993_v59  ;;  %v1562_v2 = vpop.f32.mrb[11].mxu1  ;;  %v1639_v62 = vld [vmem:[%s1948_s10] sm:$0xff] (!%p1482_p5)  }
 0x1d9   : > { %v863_v3 = vmax.f32 %v861_v57, %v862_v61  ;;  %v1700_v57 = vmov (!%p1482_p5), 0.0   ;;  %v1641_v2 = vld [vmem:[%s1948_s10 + $0x8] sm:$0xff] (!%p1482_p5)  }
 0x1da   : > { %v1002_v4 = vsel %vm804_vm2, %v1001_v1, -inf  ;;  %1577 = vmatprep.subr.bf16.mxu1 (!%p1482_p5), %v1700_v57  ;;  %1581 = vmatprep.mubr.msk.bf16.mxu1 (!%p1482_p5), %vm1701_vm4, %v1700_v57 }
 0x1db   : > { %v864_v5 = vrot.slane %v863_v3, 1  ;;  %v1003_v6 = vrot.slane %v1002_v4, 4 }
 0x1dd   : > { %v865_v7 = vmax.f32 %v863_v3, %v864_v5  ;;  %v1004_v8 = vmax.f32 %v1002_v4, %v1003_v6  ;;  %v1642_v3 = vld [vmem:[%s1948_s10 + $0x8] sm:$0xff] (!%p1482_p5)   ;;  %v1483_v6 = vld [vmem:[%s1949_s11] ss:$0 sm:$0xff] (!%p1482_p5) }
 0x1df   : > { %v866_v9 = vsub.f32 %v858_v53, %v865_v7  ;;  %v1005_v10 = vrot.slane %v1004_v8, 2 }
 0x1e1   : > { %v867_v11 = vmul.f32 1.442695, %v866_v9  ;;  %v1006_v12 = vmax.f32 %v1004_v8, %v1005_v10 }
 0x1e3   : > { %1631 = vpow2.f32 %v867_v11  ;;  %v1007_v13 = vrot.slane %v1006_v12, 1 }
 0x1e5   : > { %v1008_v14 = vmax.f32 %v1006_v12, %v1007_v13 }
 0x1e7   : > { %v1009_v15 = vsub.f32 %v1001_v1, %v1008_v14  ;;  %v1640_v1 = vld [vmem:[%s1948_s10] sm:$0xff] (!%p1482_p5)  }
 0x1e8   : > { %1578 = vmatpush3.bf16.msra.mxu1 (!%p1482_p5), %v1640_v1 }
 0x1e9   : > { %v1010_v16 = vmul.f32 1.442695, %v1009_v15  ;;  %1579 = vmatprep.subr.bf16.mxu1 (!%p1482_p5), %v1700_v57 }
 0x1eb   : > { %1633 = vpow2.f32 %v1010_v16 }
 0x1ec   : > { %1580 = vmatpush3.bf16.msra.mxu1 (!%p1482_p5), %v1642_v3 }
 0x1ed   : > { %v1632_v17 = vpop.eup %1631 }
 0x1ee   : > { %v869_v18 = vsel %vm804_vm2, %v1632_v17, 0.0 }
 0x1ef   : > { %v870_v19 = vrot.slane %v869_v18, 4 }
 0x1f1   : > { %v871_v20 = vadd.f32 %v870_v19, %v869_v18 }
 0x1f3   : > { %v872_v21 = vrot.slane %v871_v20, 2 }
 0x1f5   : > { %v1634_v22 = vpop.eup %1633  ;;  %v873_v23 = vadd.f32 %v872_v21, %v871_v20 }
 0x1f6   : > { %v1012_v24 = vsel %vm804_vm2, %v1634_v22, 0.0 }
 0x1f7   : > { %v1013_v25 = vrot.slane %v1012_v24, 4  ;;  %v874_v26 = vrot.slane %v873_v23, 1 }
 0x1f9   : > { %v1014_v27 = vadd.f32 %v1013_v25, %v1012_v24  ;;  %v875_v28 = vadd.f32 %v874_v26, %v873_v23 }
 0x1fb   : > { %v1015_v29 = vrot.slane %v1014_v27, 2  ;;  %1635 = vrcp.f32 %v875_v28 }
 0x1fd   : > { %v1016_v30 = vadd.f32 %v1015_v29, %v1014_v27 }
 0x1ff   : > { %v1017_v31 = vrot.slane %v1016_v30, 1 }
 0x201   : > { %v1018_v32 = vadd.f32 %v1017_v31, %v1016_v30 }
 0x203   : > { %1637 = vrcp.f32 %v1018_v32 }
 0x205   : > { %v1636_v33 = vpop.eup %1635 }
 0x206   : > { %v877_v34 = vmul.f32 %v1636_v33, %v1632_v17 }
 0x208   : > { %v878_v35 = vpack.c.bf16 %v877_v34, %v877_v34 }
 0x20a   : > { %v900_v36 = vsel %vm898_vm3, %v878_v35, 0 }
 0x20b   : > { %1552 = vmatpush3.bf16.msra.mxu0 %v900_v36 }
 0x20c   : > { %1563 = vmatprep.subr.bf16.mxu0 %v1697_v0 }
 0x20d   : > { %v1638_v38 = vpop.eup %1637 }
 0x20e   : > { %1554 = vmatmul.mubr.msk.bf16.vlgmr.msra.gmra.mrb[8].mxu0 %vm804_vm2, %v887_v37  ;;  %v1020_v39 = vmul.f32 %v1638_v38, %v1634_v22 }
 0x20f   : > { %1565 = vmatprep.mubr.msk.bf16.mxu0 %vm1698_vm0, %v1697_v0 }
 0x210   : > { %v1021_v40 = vpack.c.bf16 %v1020_v39, %v1020_v39 }
 0x212   : > { %v1042_v41 = vsel %vm898_vm3, %v1021_v40, 0 }
 0x213   : > { %1564 = vmatpush3.bf16.msra.mxu0 %v1042_v41 }
 0x214   : > { %1569 = vmatprep.subr.bf16.mxu0 (!%p1482_p5), %v1700_v57 }
 0x216   : > { %1566 = vmatmul.mubr.msk.bf16.vlgmr.msra.gmra.mrb[12].mxu0 %vm804_vm2, %v1030_v42 }
 0x217   : > { %1573 = vmatprep.mubr.msk.bf16.mxu0 (!%p1482_p5), %vm1701_vm4, %v1700_v57  ;;  %1570 = vmatpush3.bf16.msra.mxu0 (!%p1482_p5), %v1639_v62 }
 0x218   : > { %1571 = vmatprep.subr.bf16.mxu0 (!%p1482_p5), %v1700_v57 }
 0x21b   : > { %1572 = vmatpush3.bf16.msra.mxu0 (!%p1482_p5), %v1641_v2 }
 0x2e1   : > { %v936_v43 = vpop.f32.mrb[8].mxu0 }
 0x2e2   : > { %943 = vst.msk [vmem:[%s942_s17] sm:$0xff] %vm804_vm2, %v936_v43  ;;  %v1555_v44 = vpop.f32.mrb[9].mxu0 }
 0x2e3   : > { %v939_v45 = vpop.f32.mrb[10].mxu0 }
 0x2e4   : > { %v1556_v46 = vpop.f32.mrb[11].mxu0 }
 0x2e6   : > { %1090 = sbr.rel (%p1482_p5) target bundleno = 1075 (0x433), region = 72 }
 0x2e9   : > { %v1078_v47 = vpop.f32.mrb[12].mxu0 }
 0x2ea   : > { %1481 = vst.msk [vmem:[%s942_s17 + $0x20] sm:$0xff] %vm804_vm2, %v1078_v47  ;;  %v1567_v48 = vpop.f32.mrb[13].mxu0 }
 0x2eb   : > { %v1081_v49 = vpop.f32.mrb[14].mxu0 }
 0x2ec   : > { %v1568_v0 = vpop.f32.mrb[15].mxu0 }
 0x2f1   : > { %v1181_v50 = vld [vmem:[#allocation2 + $0x20] sm:$0xff]  ;;  %v1182_v51 = vld [vmem:[#allocation2 + $0x28] sm:$0xff]  ;;  %v1183_v55 = vld [vmem:[#allocation2 + $0x30] sm:$0xff] }
 0x2f2   : > { %v1091_v52 = vld [vmem:[#allocation2] sm:$0xff]  ;;  %v1185_v53 = vpack.c.bf16 %v1182_v51, %v1181_v50  ;;  %v1092_v54 = vld [vmem:[#allocation2 + $0x8] sm:$0xff]  ;;  %v1184_v56 = vld [vmem:[#allocation2 + $0x38] sm:$0xff] }
 0x2f3   : > { %v1095_v58 = vpack.c.bf16 %v1092_v54, %v1091_v52  ;;  %v1093_v59 = vld [vmem:[#allocation2 + $0x10] sm:$0xff]  ;;  %v1094_v60 = vld [vmem:[#allocation2 + $0x18] sm:$0xff]  ;;  %v1186_v61 = vpack.c.bf16 %v1184_v56, %v1183_v55 }
 0x2f4   : > { %1198 = vxpose.xlu1.c.b16.start [1/2] (short) (narrow) %v1185_v53, 16  ;;  %v1096_v63 = vpack.c.bf16 %v1094_v60, %v1093_v59 }
 0x2f5   : > { %1108 = vxpose.xlu0.c.b16.start [1/2] (short) (narrow) %v1095_v58, 16 }
 0x2f8   : > { %1199 = vxpose.xlu1.c.b16.end [2/2] (short) (narrow) %v1186_v61, 16 }
 0x2f9   : > { %1109 = vxpose.xlu0.c.b16.end [2/2] (short) (narrow) %v1096_v63, 16 }
 0x35a   : > { %v1206_v4 = vpop.trf.xlu1 }
 0x35b   : > { %v1116_v5 = vpop.trf.xlu0  ;;  %1582 = vmatmul.mubr.msk.bf16.vlgmr.msra.gmra.mrb[0].mxu1 %vm621_vm1, %v1206_v4 }
 0x35c   : > { %1574 = vmatmul.mubr.msk.bf16.vlgmr.msra.gmra.mrb[0].mxu0 %vm621_vm1, %v1116_v5 }
 0x42e   : > { %v1263_v7 = vpop.f32.mrb[0].mxu1 }
 0x42f   : > { %v1173_v8 = vpop.f32.mrb[0].mxu0  ;;  %v1264_v9 = vadd.f32 %v1483_v6, %v1263_v7  ;;  %v1583_v10 = vpop.f32.mrb[1].mxu1 }
 0x430   : > { %v1174_v11 = vadd.f32 %v1483_v6, %v1173_v8  ;;  %v1575_v12 = vpop.f32.mrb[1].mxu0  ;;  %v1266_v13 = vpop.f32.mrb[2].mxu1 }
 0x431   : > { %1269 = vst.msk [vmem:[#allocation3 + $0x8] sm:$0xff] %vm621_vm1, %v1264_v9  ;;  %v1176_v14 = vpop.f32.mrb[2].mxu0  ;;  %v1584_v15 = vpop.f32.mrb[3].mxu1 }
 0x432   : > { %1179 = vst.msk [vmem:[#allocation3] sm:$0xff] %vm621_vm1, %v1174_v11  ;;  %v1576_v16 = vpop.f32.mrb[3].mxu0 }
 0x433 PF: > { %s1951_s27 = sadd.s32 4294967295, %s1695_s23   ;;  %s1702_s15 = smov [#allocation3]  }
 0x434   : > { %p1903_p6 = scmp.eq.s32.totalorder %s1951_s27, 3  ;;  %s1279_s26 = sshll.u32 %s1702_s15, 4  ;;  %s1280_s26 = int_to_ptr.vmem [resolvable:$true] %s1279_s26 }
 0x435   : > { %s1643_s17 = scalar_lea.vmem %s1280_s26, 256  ;;  %p1650_p10 = scmp.lt.s32.totalorder %s1280_s26, %s1280_s26 }
 0x436   : > { %p1644_p7 = scmp.ne.s32.totalorder %s1280_s26, %s1643_s17  ;;  %p1651_p11 = scmp.lt.s32.totalorder %s1643_s17, %s1643_s17 }
 0x438   : > { %p1645_p8 = pnand %p1644_p7, %p1903_p6  ;;  %p1652_p12 = por %p1651_p11, %p1650_p10 }
 0x43a   : > { %p1646_p9 = pneg %p1645_p8 }
 0x43c   : > { %p1653_p13 = pnand %p1652_p12, %p1646_p9 }
 0x43e   : > { %1656 = shalt.err (!%p1653_p13)
}
 0x43f   : > { %s1657_s19 = scalar_lea.hbm %s1950_s12, 256 }
 0x440   : > { %p1658_p0 = scmp.ne.s32.totalorder %s1950_s12, %s1657_s19  ;;  %p1663_p3 = scmp.lt.u32.totalorder %s1657_s19, %s1950_s12 }
 0x442   : > { %p1659_p1 = pnand %p1658_p0, %p1903_p6 }
 0x444   : > { %p1660_p2 = pneg %p1659_p1 }
 0x446   : > { %p1665_p4 = pnand %p1663_p3, %p1660_p2 }
 0x448   : > { %1668 = shalt.err (!%p1665_p4)
}
 0x449   : > { %s1703_s14 = smov 128   ;;  %s1704_s16 = smov 8  }
 0x44a   : > { %1586 = dma.vmem_to_hbm [thread:$0]  (%p1903_p6), %s1280_s26, 256, %s1950_s12, [#allocation4], %s1703_s14, %s1703_s14, %s1704_s16  }
 0x44b   : > { %1682 = dma.done.wait (%p1903_p6), [#allocation4], 256  }
 0x44c   : > { %1684 = vsyncadd (%p1903_p6), [#allocation4], 4294967040 }
 0x44d PF: > { %s23_s23 = sadd.s32 1, %s1695_s23   ;;  %s1953_s21 = smov %s1691_s22 }
 0x44e   : > { %p20_p5 = scmp.ge.s32.totalorder %s23_s23, 6   ;;  %s1954_s22 = smov %s1956_s25 }
 0x450   :  { %22 = sbr.rel (!%p20_p5) target bundleno = 2 (0x2), region = 131 }
 0x457   :  { %1295 = vsyncpa [#allocation4], 1 }
 0x458   :  { %1297 = vsyncpa [#allocation4 + $0x1], 1 }

</bundles_post_ra>
